<compile_context>
chip_gen: v7x
topology: tpu7x:2x2x1
jax: 0.10.0
libtpu: 0.0.40
codegen_flags: <defaults>
</compile_context>

<pallas_src>
import functools

import jax
import jax.numpy as jnp
from jax.experimental import pallas as pl
from jax.experimental.pallas import tpu as pltpu


def _model_h_kernel(x_ref, y_ref, m_ref, o_ref, *, wrt_high_res):
    """Elementwise hot path.

    x_ref: (3, R, C)  state slabs = [low_res, anom_glob, anom_swath]
    y_ref: (2, R, C)  obs   slabs = [oi, obs]
    m_ref: (2, R, C)  mask  slabs = [ones, obs_mask]
    o_ref: (2, R, C)  dyout_glob + dyout_swath
    """
    low = x_ref[0]
    ag = x_ref[1]
    asw = x_ref[2]

    glob = low + ag                               # output_global
    base = glob if wrt_high_res else low          # swot_anom_wrt
    swath = base + asw                            # output_swath

    y1 = y_ref[0]
    y2 = y_ref[1]
    m1 = m_ref[0]
    m2 = m_ref[1]

    d1 = (low - y1) * m1
    o_ref[0] = d1 + d1                            # == 2*(low - y1)*m1
    o_ref[1] = ((glob - y2) + (swath - y2)) * m2


def _choose_tile_rows(M, itemsize, vmem_budget_bytes=8 << 20):
    """Largest row tile (multiple of 8, dividing M) under a VMEM budget.

    Per pipeline stage we hold 9 slabs of (tm, 128) (x:3 + y:2 + m:2 + o:2),
    each double-buffered by the BlockSpec pipeline.
    """
    if M % 8 != 0:
        # Full-extent second-to-last dim satisfies the (8,128) rule by equality.
        return M
    bytes_per_row = 9 * 128 * itemsize
    cap = max(8, vmem_budget_bytes // (2 * bytes_per_row))
    best = 8
    t = 8
    top = min(M, cap)
    while t <= top:
        if M % t == 0:
            best = t
        t += 8
    return best


def model_h_with_noisy_swot(x, y, mask, *, dT, swot_anom_wrt="high_res"):
    B, C3, H, W = x.shape
    assert C3 == 3 * dT, "x must have 3*dT channels"
    C2 = 2 * dT
    assert y.shape == (B, C2, H, W) and mask.shape == (B, C2, H, W)
    if swot_anom_wrt not in ("high_res", "low_res"):
        raise ValueError(swot_anom_wrt)

    L = dT * H * W                     # elements per component slab
    itemsize = jnp.dtype(x.dtype).itemsize
    kernel = functools.partial(
        _model_h_kernel, wrt_high_res=(swot_anom_wrt == "high_res")
    )
    cost = pl.CostEstimate(
        flops=9 * B * L,
        transcendentals=0,
        bytes_accessed=9 * B * L * itemsize,   # 7 input slabs + 2 output slabs
    )

    if L % 128 == 0:
        # Lane-dense, reshape-only layout: (B, C, M, 128), M = L / 128.
        M = L // 128
        tm = _choose_tile_rows(M, itemsize)
        assert M % tm == 0
        x_r = x.reshape(B, 3, M, 128)
        y_r = y.reshape(B, 2, M, 128)
        m_r = mask.reshape(B, 2, M, 128)

        out_r = pl.pallas_call(
            kernel,
            out_shape=jax.ShapeDtypeStruct((B, 2, M, 128), x.dtype),
            grid=(B, M // tm),
            in_specs=[
                pl.BlockSpec((None, 3, tm, 128), lambda b, j: (b, 0, j, 0)),
                pl.BlockSpec((None, 2, tm, 128), lambda b, j: (b, 0, j, 0)),
                pl.BlockSpec((None, 2, tm, 128), lambda b, j: (b, 0, j, 0)),
            ],
            out_specs=pl.BlockSpec((None, 2, tm, 128), lambda b, j: (b, 0, j, 0)),
            compiler_params=pltpu.CompilerParams(
                dimension_semantics=("parallel", "parallel"),
            ),
            cost_estimate=cost,
        )(x_r, y_r, m_r)
        return out_r.reshape(B, C2, H, W)

    # Fallback: H*W not a multiple of 128 — use (B, C, dT, H*W) full-extent
    # blocks (legal by the "equals full array dim" rule).
    # TODO(synk): spatial tiling with masked edge blocks for very large,
    # non-128-multiple H*W (full-extent blocks could exceed VMEM there).
    N = H * W
    x_r = x.reshape(B, 3, dT, N)
    y_r = y.reshape(B, 2, dT, N)
    m_r = mask.reshape(B, 2, dT, N)
    out_r = pl.pallas_call(
        kernel,
        out_shape=jax.ShapeDtypeStruct((B, 2, dT, N), x.dtype),
        grid=(B,),
        in_specs=[
            pl.BlockSpec((None, 3, dT, N), lambda b: (b, 0, 0, 0)),
            pl.BlockSpec((None, 2, dT, N), lambda b: (b, 0, 0, 0)),
            pl.BlockSpec((None, 2, dT, N), lambda b: (b, 0, 0, 0)),
        ],
        out_specs=pl.BlockSpec((None, 2, dT, N), lambda b: (b, 0, 0, 0)),
        compiler_params=pltpu.CompilerParams(
            dimension_semantics=("parallel",),
        ),
        cost_estimate=cost,
    )(x_r, y_r, m_r)
    return out_r.reshape(B, C2, H, W)


def _reference(x, y, mask, *, dT, swot_anom_wrt="high_res"):
    """Pure-JAX reference mirroring the PyTorch forward exactly."""
    low, ag, asw = jnp.split(x, 3, axis=1)
    glob = low + ag
    if swot_anom_wrt == "low_res":
        swath = low + asw
    elif swot_anom_wrt == "high_res":
        swath = glob + asw
    else:
        raise ValueError(swot_anom_wrt)
    yhat_glob = jnp.concatenate((low, glob), axis=1)
    yhat_swath = jnp.concatenate((low, swath), axis=1)
    dyout_glob = (yhat_glob - y) * mask
    dyout_swath = (yhat_swath - y) * mask
    return dyout_glob + dyout_swath


if __name__ == "__main__":
    # Small shapes consistent with the module:
    #   B=2, dT=4 (hparams.dT), H=W=16
    #   state x: [B, 3*dT, H, W], obs y / mask: [B, 2*dT, H, W]
    B, dT, H, W = 2, 4, 16, 16
    key = jax.random.PRNGKey(0)
    kx, ky, km = jax.random.split(key, 3)

    x = jax.random.normal(kx, (B, 3 * dT, H, W), dtype=jnp.float32)
    y = jax.random.normal(ky, (B, 2 * dT, H, W), dtype=jnp.float32)
    # mask = [ones, obs_mask]: first dT channels are ones, rest is a 0/1 mask.
    obs_mask = (jax.random.uniform(km, (B, dT, H, W)) > 0.5).astype(jnp.float32)
    mask = jnp.concatenate(
        (jnp.ones((B, dT, H, W), dtype=jnp.float32), obs_mask), axis=1
    )

    for mode in ("high_res", "low_res"):
        out = model_h_with_noisy_swot(x, y, mask, dT=dT, swot_anom_wrt=mode)
        out = jax.block_until_ready(out)
        ref = _reference(x, y, mask, dT=dT, swot_anom_wrt=mode)
        assert out.shape == (B, 2 * dT, H, W)
        # (one harmless FP reassociation vs the reference: mask factored out)
        assert jnp.allclose(out, ref, atol=1e-5, rtol=1e-5), mode

    print("KERNEL_OK")
</pallas_src>

<mosaic_0001>
module attributes {stable_mosaic.version = 11 : i64} {
  func.func @_model_h_kernel(%arg0: i32, %arg1: i32, %arg2: memref<1x3x8x128xf32, #tpu.memory_space<vmem>>, %arg3: memref<1x2x8x128xf32, #tpu.memory_space<vmem>>, %arg4: memref<1x2x8x128xf32, #tpu.memory_space<vmem>>, %arg5: memref<1x2x8x128xf32, #tpu.memory_space<vmem>>) attributes {dimension_semantics = [#tpu.dimension_semantics<parallel>, #tpu.dimension_semantics<parallel>], iteration_bounds = array<i64: 2, 1>, scalar_prefetch = 0 : i64, scratch_operands = 0 : i64, tpu.core_type = #tpu.core_type<tc>, window_params = [{transform_indices = @transform_0, window_bounds = array<i64: 1, 3, 8, 128>}, {transform_indices = @transform_1, window_bounds = array<i64: 1, 2, 8, 128>}, {transform_indices = @transform_2, window_bounds = array<i64: 1, 2, 8, 128>}, {transform_indices = @transform_3, window_bounds = array<i64: 1, 2, 8, 128>}]} {
    %c0 = arith.constant 0 : index
    %c0_0 = arith.constant 0 : index
    %c0_1 = arith.constant 0 : index
    %c0_2 = arith.constant 0 : index
    %0 = vector.load %arg2[%c0, %c0_0, %c0_1, %c0_2] : memref<1x3x8x128xf32, #tpu.memory_space<vmem>>, vector<1x1x8x128xf32>
    %1 = vector.shape_cast %0 : vector<1x1x8x128xf32> to vector<8x128xf32>
    %c0_3 = arith.constant 0 : index
    %c1 = arith.constant 1 : index
    %c0_4 = arith.constant 0 : index
    %c0_5 = arith.constant 0 : index
    %2 = vector.load %arg2[%c0_3, %c1, %c0_4, %c0_5] : memref<1x3x8x128xf32, #tpu.memory_space<vmem>>, vector<1x1x8x128xf32>
    %3 = vector.shape_cast %2 : vector<1x1x8x128xf32> to vector<8x128xf32>
    %c0_6 = arith.constant 0 : index
    %c2 = arith.constant 2 : index
    %c0_7 = arith.constant 0 : index
    %c0_8 = arith.constant 0 : index
    %4 = vector.load %arg2[%c0_6, %c2, %c0_7, %c0_8] : memref<1x3x8x128xf32, #tpu.memory_space<vmem>>, vector<1x1x8x128xf32>
    %5 = vector.shape_cast %4 : vector<1x1x8x128xf32> to vector<8x128xf32>
    %6 = arith.addf %1, %3 : vector<8x128xf32>
    %7 = arith.addf %6, %5 : vector<8x128xf32>
    %c0_9 = arith.constant 0 : index
    %c0_10 = arith.constant 0 : index
    %c0_11 = arith.constant 0 : index
    %c0_12 = arith.constant 0 : index
    %8 = vector.load %arg3[%c0_9, %c0_10, %c0_11, %c0_12] : memref<1x2x8x128xf32, #tpu.memory_space<vmem>>, vector<1x1x8x128xf32>
    %9 = vector.shape_cast %8 : vector<1x1x8x128xf32> to vector<8x128xf32>
    %c0_13 = arith.constant 0 : index
    %c1_14 = arith.constant 1 : index
    %c0_15 = arith.constant 0 : index
    %c0_16 = arith.constant 0 : index
    %10 = vector.load %arg3[%c0_13, %c1_14, %c0_15, %c0_16] : memref<1x2x8x128xf32, #tpu.memory_space<vmem>>, vector<1x1x8x128xf32>
    %11 = vector.shape_cast %10 : vector<1x1x8x128xf32> to vector<8x128xf32>
    %c0_17 = arith.constant 0 : index
    %c0_18 = arith.constant 0 : index
    %c0_19 = arith.constant 0 : index
    %c0_20 = arith.constant 0 : index
    %12 = vector.load %arg4[%c0_17, %c0_18, %c0_19, %c0_20] : memref<1x2x8x128xf32, #tpu.memory_space<vmem>>, vector<1x1x8x128xf32>
    %13 = vector.shape_cast %12 : vector<1x1x8x128xf32> to vector<8x128xf32>
    %c0_21 = arith.constant 0 : index
    %c1_22 = arith.constant 1 : index
    %c0_23 = arith.constant 0 : index
    %c0_24 = arith.constant 0 : index
    %14 = vector.load %arg4[%c0_21, %c1_22, %c0_23, %c0_24] : memref<1x2x8x128xf32, #tpu.memory_space<vmem>>, vector<1x1x8x128xf32>
    %15 = vector.shape_cast %14 : vector<1x1x8x128xf32> to vector<8x128xf32>
    %16 = arith.subf %1, %9 : vector<8x128xf32>
    %17 = arith.mulf %16, %13 : vector<8x128xf32>
    %18 = arith.addf %17, %17 : vector<8x128xf32>
    %c0_25 = arith.constant 0 : index
    %c0_26 = arith.constant 0 : index
    %c0_27 = arith.constant 0 : index
    %c0_28 = arith.constant 0 : index
    %19 = vector.load %arg5[%c0_25, %c0_26, %c0_27, %c0_28] : memref<1x2x8x128xf32, #tpu.memory_space<vmem>>, vector<1x1x8x128xf32>
    %20 = vector.shape_cast %19 : vector<1x1x8x128xf32> to vector<8x128xf32>
    %21 = vector.shape_cast %18 : vector<8x128xf32> to vector<1x1x8x128xf32>
    tpu.vector_store %arg5[%c0_25, %c0_26, %c0_27, %c0_28], %21 {strides = array<i32>} : memref<1x2x8x128xf32, #tpu.memory_space<vmem>>, vector<1x1x8x128xf32>,
    %22 = arith.subf %6, %11 : vector<8x128xf32>
    %23 = arith.subf %7, %11 : vector<8x128xf32>
    %24 = arith.addf %22, %23 : vector<8x128xf32>
    %25 = arith.mulf %24, %15 : vector<8x128xf32>
    %c0_29 = arith.constant 0 : index
    %c1_30 = arith.constant 1 : index
    %c0_31 = arith.constant 0 : index
    %c0_32 = arith.constant 0 : index
    %26 = vector.load %arg5[%c0_29, %c1_30, %c0_31, %c0_32] : memref<1x2x8x128xf32, #tpu.memory_space<vmem>>, vector<1x1x8x128xf32>
    %27 = vector.shape_cast %26 : vector<1x1x8x128xf32> to vector<8x128xf32>
    %28 = vector.shape_cast %25 : vector<8x128xf32> to vector<1x1x8x128xf32>
    tpu.vector_store %arg5[%c0_29, %c1_30, %c0_31, %c0_32], %28 {strides = array<i32>} : memref<1x2x8x128xf32, #tpu.memory_space<vmem>>, vector<1x1x8x128xf32>,
    return
  }
  func.func @transform_0(%arg0: i32, %arg1: i32) -> (i32, i32, i32, i32) {
    %c0_i32 = arith.constant 0 : i32
    %c0_i32_0 = arith.constant 0 : i32
    %c0_i32_1 = arith.constant 0 : i32
    return %arg0, %c0_i32, %arg1, %c0_i32_0 : i32, i32, i32, i32
  }
  func.func @transform_1(%arg0: i32, %arg1: i32) -> (i32, i32, i32, i32) {
    %c0_i32 = arith.constant 0 : i32
    %c0_i32_0 = arith.constant 0 : i32
    %c0_i32_1 = arith.constant 0 : i32
    return %arg0, %c0_i32, %arg1, %c0_i32_0 : i32, i32, i32, i32
  }
  func.func @transform_2(%arg0: i32, %arg1: i32) -> (i32, i32, i32, i32) {
    %c0_i32 = arith.constant 0 : i32
    %c0_i32_0 = arith.constant 0 : i32
    %c0_i32_1 = arith.constant 0 : i32
    return %arg0, %c0_i32, %arg1, %c0_i32_0 : i32, i32, i32, i32
  }
  func.func @transform_3(%arg0: i32, %arg1: i32) -> (i32, i32, i32, i32) {
    %c0_i32 = arith.constant 0 : i32
    %c0_i32_0 = arith.constant 0 : i32
    %c0_i32_1 = arith.constant 0 : i32
    return %arg0, %c0_i32, %arg1, %c0_i32_0 : i32, i32, i32, i32
  }
}

</mosaic_0001>

<bundles_post_ra>
// kernel: tpu_custom_call.1
= control target key start
LH: loop header
LB: loop body
LE: loop exit
PB: predicated region body
PF: predicated region fallthrough
CT: control target
= control target key end

     0   :  { %s1046_s0 = inlined_call_operand.hbm [shape: f32[2,3,8,128], index: 0, kind: input, shape index: {}]   ;;  %s1047_s1 = inlined_call_operand.hbm [shape: f32[2,2,8,128], index: 1, kind: input, shape index: {}]   ;;  %s1048_s2 = inlined_call_operand.hbm [shape: f32[2,2,8,128], index: 2, kind: input, shape index: {}]   ;;  %s1049_s3 = inlined_call_operand.hbm [shape: f32[2,2,8,128], index: 3, kind: output, shape index: {}]  }
   0x1   :  { %1058 = sst [smem:[#allocation14_spill]] %s1047_s1 }
   0x2   :  { %8 = vsyncpa [#allocation3], 0 }
   0x3   :  { %10 = vsyncpa [#allocation3 + $0x1], 0 }
   0x4   :  { %11 = vsyncpa [#allocation6], 0 }
   0x5   :  { %13 = vsyncpa [#allocation6 + $0x1], 0 }
   0x6   :  { %14 = vsyncpa [#allocation4], 0 }
   0x7   :  { %16 = vsyncpa [#allocation4 + $0x1], 0  ;;  %s772_s12 = smov 0   ;;  %s774_s13 = smov 0  }
   0x8   :  { %s776_s14 = smov 0   ;;  %s778_s15 = smov 0  }
   0x9   :  { %s780_s16 = smov 0   ;;  %s782_s17 = smov 0  }
   0xa LB: > { %1059 = sst [smem:[#allocation12_spill]] %s738_s16  ;;  %s803_s18 = sadd.s32 4294967295, %s742_s17   ;;  %s742_s17 = sphi %s782_s17, %s22_s17   ;;  %s738_s16 = sphi %s780_s16, %s1077_s16   ;;  %s734_s15 = sphi %s778_s15, %s1076_s15   ;;  %s730_s14 = sphi %s776_s14, %s1080_s14   ;;  %s726_s13 = sphi %s774_s13, %s1079_s13   ;;  %s722_s12 = sphi %s772_s12, %s1078_s12  }
   0xb   : > { %s460_s19 = sadd.s32 4294967294, %s742_s17   ;;  %s34_s20 = sadd.s32 1, %s738_s16 }
   0xc   : > { %s43_s21 = sadd.s32 1, %s730_s14  ;;  %p36_p0 = scmp.ge.s32.totalorder %s34_s20, 2 }
   0xd   : > { %p50_p1 = scmp.ne.s32.totalorder %s730_s14, %s726_s13  ;;  %p51_p2 = scmp.eq.s32.totalorder %s742_s17, 0 }
   0xe   : > { %p56_p3 = scmp.ne.s32.totalorder %s726_s13, %s722_s12  ;;  %s1082_s20 = smov (%p36_p0, %s34_s20), 0 }
   0xf   : > { %1060 = sst [smem:[#allocation13_spill]] %s1082_s20  ;;  %p815_p4 = por %p51_p2, %p50_p1 }
  0x10   : > { %p57_p5 = scmp.eq.s32.totalorder %s803_s18, 0  ;;  %s38_s23 = ssub.s32 %s738_s16, %s1082_s20 }
  0x11   : > { %p138_p6 = scmp.eq.s32.totalorder %s803_s18, 1  ;;  %p41_p7 = scmp.eq.s32.totalorder %s38_s23, 0 }
  0x12   : > { %p823_p8 = por %p57_p5, %p56_p3  ;;  %p144_p10 = scmp.eq.s32.totalorder %s460_s19, 1 }
  0x13   : > { %p827_p9 = por %p138_p6, %p50_p1  ;;  %p512_p13 = scmp.lt.s32.totalorder %s742_s17, 2 }
  0x14   : > { %s1062_s24 = scalar_select %p823_p8, 1, 0 }
  0x15   : > { %s1063_s25 = scalar_select %p827_p9, 1, 0 }
  0x16   : > { %s832_s26 = scalar_select %p41_p7, %s730_s14, %s43_s21  }
  0x17   : > { %p834_p11 = por %p144_p10, %p56_p3  ;;  %s841_s28 = sand.u32 1, %s730_s14  }
  0x18   : > { %p845_p0 = pnand %p512_p13, %p815_p4  ;;  %s186_s30 = sand.u32 1, %s742_s17  }
  0x19   : > { %s1064_s27 = scalar_select %p834_p11, 1, 0 }
  0x1a   : > { %s464_s4 = sshll.u32 %s841_s28, 4  ;;  %s484_s5 = sshll.u32 %s738_s16, 8 }
  0x1b   : > { %s190_s6 = scalar_lea.vmem [#allocation5], %s464_s4  ;;  %s1066_s1 = sld [smem:[#allocation14_spill]] }
  0x1c   : > { %s198_s7 = sshll.u32 %s190_s6, 4  ;;  %s863_s11 = scalar_lea.sflag [#allocation6], %s186_s30  ;;  %s861_s7 = int_to_ptr.vmem [resolvable:$true] %s198_s7 }
  0x1d   : > { %p869_p2 = pneg %p845_p0 }
  0x21   : > { %s859_s10 = scalar_lea.hbm %s1066_s1, %s484_s5  ;;  %s571_s6 = scalar_lea.hbm %s1066_s1, 512 }
  0x22   : > { %s566_s19 = scalar_lea.hbm %s859_s10, 256  ;;  %p572_p5 = scmp.lt.u32.totalorder %s859_s10, %s1066_s1 }
  0x23   : > { %p567_p1 = scmp.ne.s32.totalorder %s859_s10, %s566_s19  ;;  %p573_p6 = scmp.lt.u32.totalorder %s571_s6, %s566_s19 }
  0x24   : > { %p575_p10 = scmp.lt.u32.totalorder %s566_s19, %s859_s10 }
  0x25   : > { %p569_p3 = pnand %p869_p2, %p567_p1  ;;  %p574_p7 = por %p573_p6, %p572_p5 }
  0x27   : > { %p570_p4 = pneg %p569_p3  ;;  %p576_p13 = por %p575_p10, %p574_p7 }
  0x29   : > { %p577_p12 = pnand %p576_p13, %p570_p4 }
  0x2b   : > { %580 = shalt.err (!%p577_p12)
}
  0x2c   : > { %s581_s30 = scalar_lea.vmem %s861_s7, 256  ;;  %s744_s22 = smov [#allocation5]  }
  0x2d   : > { %p582_p1 = scmp.ne.s32.totalorder %s861_s7, %s581_s30  ;;  %s586_s23 = sshll.u32 %s744_s22, 4  ;;  %s587_s23 = int_to_ptr.vmem [resolvable:$false] %s586_s23 }
  0x2e   : > { %s588_s8 = scalar_lea.vmem %s587_s23, 512  ;;  %p589_p9 = scmp.lt.s32.totalorder %s861_s7, %s587_s23 }
  0x2f   : > { %p584_p3 = pnand %p582_p1, %p869_p2  ;;  %p590_p8 = scmp.lt.s32.totalorder %s588_s8, %s581_s30 }
  0x31   : > { %p585_p11 = pneg %p584_p3  ;;  %p591_p5 = por %p590_p8, %p589_p9 }
  0x33   : > { %p592_p6 = pnand %p591_p5, %p585_p11 }
  0x35   : > { %595 = shalt.err (!%p592_p6)
}
  0x36   : > { %s1053_s19 = smov 128   ;;  %s1055_s6 = smov 8  }
  0x37   : > { %504 = dma.hbm_to_vmem [thread:$0]  (!%p845_p0), %s859_s10, 256, %s861_s7, %s863_s11, %s1053_s19, %s1053_s19, %s1055_s6  }
  0x38   : > { %p470_p8 = scmp.ge.s32.totalorder %s742_s17, 1  ;;  %p228_p9 = scmp.lt.s32.totalorder %s742_s17, 3 }
  0x39   : > { %s212_s9 = scalar_lea.vmem [#allocation7], %s464_s4  ;;  %s909_s1 = scalar_lea.hbm %s1048_s2, %s484_s5 }
  0x3a   : > { %s220_s30 = sshll.u32 %s212_s9, 4  ;;  %p900_p11 = pnand %p470_p8, %p228_p9  ;;  %s912_s30 = int_to_ptr.vmem [resolvable:$true] %s220_s30 }
  0x3b   : > { %s487_s20 = smul.u32 24, %s841_s28  ;;  %s165_s23 = scalar_lea.sflag [#allocation3], %s841_s28 }
  0x3c   : > { %s1068_s22 = scalar_select %p900_p11, 1, 0 }
  0x3d   : > { %s488_s7 = smul.u32 384, %s738_s16  ;;  %s168_s4 = scalar_lea.vmem [#allocation2], %s487_s20 }
  0x3e   : > { %s176_s9 = sshll.u32 %s168_s4, 4  ;;  %s601_s19 = scalar_lea.hbm %s1046_s0, 768  ;;  %s920_s9 = int_to_ptr.vmem [resolvable:$true] %s176_s9 }
  0x3f   : > { %s918_s6 = scalar_lea.hbm %s1046_s0, %s488_s7 }
  0x40   : > { %s596_s5 = scalar_lea.hbm %s918_s6, 384  ;;  %p602_p10 = scmp.lt.u32.totalorder %s918_s6, %s1046_s0 }
  0x41   : > { %p597_p12 = scmp.ne.s32.totalorder %s918_s6, %s596_s5  ;;  %p603_p13 = scmp.lt.u32.totalorder %s601_s19, %s596_s5 }
  0x42   : > { %p605_p3 = scmp.lt.u32.totalorder %s596_s5, %s918_s6 }
  0x43   : > { %p599_p4 = pnand %p597_p12, %p869_p2  ;;  %p604_p1 = por %p603_p13, %p602_p10 }
  0x45   : > { %p600_p7 = pneg %p599_p4  ;;  %p606_p5 = por %p605_p3, %p604_p1 }
  0x47   : > { %p607_p6 = pnand %p606_p5, %p600_p7 }
  0x49   : > { %610 = shalt.err (!%p607_p6)
}
  0x4a   : > { %s611_s20 = scalar_lea.vmem %s920_s9, 384  ;;  %s747_s16 = smov [#allocation2]  }
  0x4b   : > { %p612_p8 = scmp.ne.s32.totalorder %s920_s9, %s611_s20  ;;  %s616_s4 = sshll.u32 %s747_s16, 4  ;;  %s617_s4 = int_to_ptr.vmem [resolvable:$false] %s616_s4 }
  0x4c   : > { %s618_s8 = scalar_lea.vmem %s617_s4, 768  ;;  %p619_p4 = scmp.lt.s32.totalorder %s920_s9, %s617_s4 }
  0x4d   : > { %p614_p9 = pnand %p612_p8, %p869_p2  ;;  %p620_p11 = scmp.lt.s32.totalorder %s618_s8, %s611_s20 }
  0x4f   : > { %p615_p12 = pneg %p614_p9  ;;  %p621_p10 = por %p620_p11, %p619_p4 }
  0x51   : > { %p622_p13 = pnand %p621_p10, %p615_p12 }
  0x53   : > { %625 = shalt.err (!%p622_p13)
}
  0x54   : > { %s1069_s5 = smov 8   ;;  %s1070_s19 = smov 128  }
  0x55   : > { %501 = dma.hbm_to_vmem [thread:$0]  (!%p845_p0), %s918_s6, 384, %s920_s9, %s165_s23, %s1070_s19, %s1070_s19, %s1069_s5  }
  0x56   : > { %s626_s7 = scalar_lea.hbm %s909_s1, 256  ;;  %s631_s16 = scalar_lea.hbm %s1048_s2, 512 }
  0x57   : > { %p627_p7 = scmp.ne.s32.totalorder %s909_s1, %s626_s7  ;;  %p632_p3 = scmp.lt.u32.totalorder %s909_s1, %s1048_s2 }
  0x58   : > { %p633_p5 = scmp.lt.u32.totalorder %s631_s16, %s626_s7  ;;  %p635_p8 = scmp.lt.u32.totalorder %s626_s7, %s909_s1 }
  0x59   : > { %p629_p11 = pnand %p627_p7, %p869_p2 }
  0x5a   : > { %p634_p6 = por %p633_p5, %p632_p3 }
  0x5b   : > { %p630_p1 = pneg %p629_p11 }
  0x5c   : > { %p636_p9 = por %p635_p8, %p634_p6 }
  0x5e   : > { %p637_p12 = pnand %p636_p9, %p630_p1 }
  0x60   : > { %640 = shalt.err (!%p637_p12)
}
  0x61   : > { %s641_s28 = scalar_lea.vmem %s912_s30, 256  ;;  %s748_s6 = smov [#allocation7]  }
  0x62   : > { %p642_p4 = scmp.ne.s32.totalorder %s912_s30, %s641_s28  ;;  %s646_s9 = sshll.u32 %s748_s6, 4  ;;  %s647_s9 = int_to_ptr.vmem [resolvable:$false] %s646_s9 }
  0x63   : > { %s648_s23 = scalar_lea.vmem %s647_s9, 512  ;;  %p649_p7 = scmp.lt.s32.totalorder %s912_s30, %s647_s9 }
  0x64   : > { %p644_p10 = pnand %p642_p4, %p869_p2  ;;  %p650_p11 = scmp.lt.s32.totalorder %s648_s23, %s641_s28 }
  0x66   : > { %p645_p13 = pneg %p644_p10  ;;  %p651_p3 = por %p650_p11, %p649_p7 }
  0x68   : > { %p652_p5 = pnand %p651_p3, %p645_p13 }
  0x6a   : > { %655 = shalt.err (!%p652_p5)
}
  0x6b   : > { %507 = dma.hbm_to_vmem [thread:$0]  (!%p845_p0), %s909_s1, 256, %s912_s30, %s863_s11, %s1070_s19, %s1070_s19, %s1069_s5  }
  0x6c   : > { %p1071_p2 = scmp.ne.s32.totalorder %s1068_s22, 0 }
  0x6d   : > { %s977_s21 = sand.u32 (!%p1071_p2), 1, %s726_s13   ;;  %p1072_p1 = scmp.ne.s32.totalorder (!%p1071_p2), %s1062_s24, 0 }
  0x6e   : > { %232 = sbr.rel (%p1071_p2) target bundleno = 148 (0x94), region = 32  ;;  %s235_s10 = scalar_lea.sflag (!%p1071_p2), [#allocation3], %s977_s21 }
  0x6f   : > { %s489_s7 = smul.u32 (!%p1071_p2), 24, %s977_s21 }
  0x71   : > { %s238_s20 = scalar_lea.vmem (!%p1071_p2), [#allocation2], %s489_s7 }
  0x75   : > { %709 = dma.done.wait (%p1072_p1), %s235_s10, 384  }
  0x76   : > { %711 = vsyncadd (%p1072_p1), %s235_s10, 4294966912  ;;  %s243_s1 = sand.u32 1, %s803_s18   ;;  %s471_s29 = sshll.u32 %s977_s21, 4 }
  0x77   : > { %s244_s11 = scalar_lea.sflag [#allocation6], %s243_s1  ;;  %s247_s30 = scalar_lea.vmem [#allocation5], %s471_s29 }
  0x78   : > { %713 = dma.done.wait (%p1072_p1), %s244_s11, 512  }
  0x79   : > { %715 = vsyncadd (%p1072_p1), %s244_s11, 4294966784  ;;  %v289_v0 = vld [vmem:[%s238_s20] sm:$0xff]  ;;  %v474_v1 = vld [vmem:[%s238_s20 + $0x8] sm:$0xff]  ;;  %s256_s22 = scalar_lea.vmem [#allocation7], %s471_s29  ;;  %s288_s18 = scalar_lea.vmem [#allocation8], %s471_s29 }
  0x7a   : > { %v296_v2 = vld [vmem:[%s247_s30] sm:$0xff]  ;;  %v294_v3 = vadd.f32 %v474_v1, %v289_v0  ;;  %v476_v7 = vld [vmem:[%s247_s30 + $0x8] sm:$0xff]  ;;  %s327_s5 = sshll.u32 %s288_s18, 4  ;;  %s486_s24 = sshll.u32 %s734_s15, 8  ;;  %s992_s5 = int_to_ptr.vmem [resolvable:$true] %s327_s5 }
  0x7b   : > { %v299_v4 = vld [vmem:[%s256_s22] sm:$0xff]  ;;  %v302_v5 = vsub.f32 %v289_v0, %v296_v2  ;;  %v477_v13 = vld [vmem:[%s256_s22 + $0x8] sm:$0xff]  ;;  %s997_s4 = scalar_lea.hbm %s1049_s3, %s486_s24  ;;  %s313_s8 = scalar_lea.sflag [#allocation4], %s977_s21 }
  0x7c   : > { %v475_v6 = vld [vmem:[%s238_s20 + $0x10] sm:$0xff]  ;;  %v306_v10 = vsub.f32 %v294_v3, %v476_v7  ;;  %s656_s28 = scalar_lea.vmem %s992_s5, 256  ;;  %p1073_p6 = scmp.ne.s32.totalorder %s1063_s25, 0 }
  0x7d   : > { %v303_v8 = vmul.f32 %v302_v5, %v299_v4  ;;  %v295_v9 = vadd.f32 %v475_v6, %v294_v3  ;;  %p657_p0 = scmp.ne.s32.totalorder %s992_s5, %s656_s28  ;;  %s749_s15 = smov [#allocation8]  }
  0x7e   : > { %s660_s6 = sshll.u32 %s749_s15, 4  ;;  %s661_s6 = int_to_ptr.vmem [resolvable:$false] %s660_s6 }
  0x7f   : > { %v304_v11 = vadd.f32 %v303_v8, %v303_v8  ;;  %v307_v12 = vsub.f32 %v295_v9, %v476_v7  ;;  %p658_p8 = pnand %p657_p0, %p1073_p6  ;;  %s662_s9 = scalar_lea.vmem %s661_s6, 512 }
  0x80   : > { %p663_p12 = scmp.lt.s32.totalorder %s992_s5, %s661_s6  ;;  %p664_p4 = scmp.lt.s32.totalorder %s662_s9, %s656_s28 }
  0x81   : > { %305 = vst [vmem:[%s288_s18] sm:$0xff] %v304_v11  ;;  %v308_v14 = vadd.f32 %v307_v12, %v306_v10  ;;  %p659_p9 = pneg %p658_p8 }
  0x82   : > { %p665_p10 = por %p664_p4, %p663_p12 }
  0x83   : > { %v309_v15 = vmul.f32 %v477_v13, %v308_v14 }
  0x84   : > { %p666_p13 = pnand %p665_p10, %p659_p9 }
  0x85   : > { %478 = vst [vmem:[%s288_s18 + $0x8] sm:$0xff] %v309_v15 }
  0x86   : > { %669 = shalt.err (!%p666_p13)
}
  0x87   : > { %s670_s23 = scalar_lea.hbm %s997_s4, 256  ;;  %s674_s20 = scalar_lea.hbm %s1049_s3, 512 }
  0x88   : > { %p671_p7 = scmp.ne.s32.totalorder %s997_s4, %s670_s23  ;;  %p675_p5 = scmp.lt.u32.totalorder %s997_s4, %s1049_s3 }
  0x89   : > { %p676_p2 = scmp.lt.u32.totalorder %s674_s20, %s670_s23  ;;  %p678_p0 = scmp.lt.u32.totalorder %s670_s23, %s997_s4 }
  0x8a   : > { %p672_p11 = pnand %p671_p7, %p1073_p6 }
  0x8b   : > { %p677_p1 = por %p676_p2, %p675_p5 }
  0x8c   : > { %p673_p3 = pneg %p672_p11 }
  0x8d   : > { %p679_p8 = por %p678_p0, %p677_p1 }
  0x8f   : > { %p680_p9 = pnand %p679_p8, %p673_p3 }
  0x91   : > { %683 = shalt.err (!%p680_p9)
}
  0x92   : > { %s750_s11 = smov 128   ;;  %s751_s30 = smov 8  }
  0x93   : > { %496 = dma.vmem_to_hbm [thread:$0]  (%p1073_p6), %s992_s5, 256, %s997_s4, %s313_s8, %s750_s11, %s750_s11, %s751_s30  }
  0x94 PF: > { %s342_s22 = sand.u32 1, %s722_s12   ;;  %p1074_p12 = scmp.ne.s32.totalorder %s1064_s27, 0 }
  0x95   : > { %p1075_p4 = scmp.ge.s32.totalorder %s742_s17, 2  ;;  %s343_s18 = scalar_lea.sflag [#allocation4], %s342_s22 }
  0x97   : > { %p509_p10 = pnand %p1075_p4, %p1074_p12 }
  0x99   : > { %717 = dma.done.wait (!%p509_p10), %s343_s18, 256  }
  0x9a   : > { %719 = vsyncadd (!%p509_p10), %s343_s18, 4294967040  ;;  %s22_s17 = sadd.s32 1, %s742_s17   ;;  %s1076_s15 = sld [smem:[#allocation12_spill]] }
  0x9b   : > { %p19_p13 = scmp.ge.s32.totalorder %s22_s17, 4   ;;  %s1077_s16 = sld [smem:[#allocation13_spill]] }
  0x9c   : > { %s1078_s12 = smov %s726_s13  ;;  %s1079_s13 = smov %s730_s14 }
  0x9d   : > { %s1080_s14 = smov %s832_s26  ;;  %21 = sbr.rel (!%p19_p13) target bundleno = 10 (0xa), region = 106 }
  0xa4   :  { %348 = vsyncpa [#allocation3], 1 }
  0xa5   :  { %350 = vsyncpa [#allocation3 + $0x1], 1 }
  0xa6   :  { %351 = vsyncpa [#allocation6], 1 }
  0xa7   :  { %353 = vsyncpa [#allocation6 + $0x1], 1 }
  0xa8   :  { %354 = vsyncpa [#allocation4], 1 }
  0xa9   :  { %356 = vsyncpa [#allocation4 + $0x1], 1 }

</bundles_post_ra>
